<compile_context>
chip_gen: v6e
topology: v6e:2x2x1
jax: 0.10.0
libtpu: 0.0.40
codegen_flags: <defaults>
</compile_context>

<pallas_src>
import math

import jax
import jax.numpy as jnp
from jax.experimental import pallas as pl
from jax.experimental.pallas import tpu as pltpu


def max_pool1d_pallas(x, kernel_size=2, stride=2):
    """Equivalent of the PyTorch MaxPool module forward.

    x: (B, L, D) array. Returns (B, L_out, D) with
    L_out = (L - kernel_size) // stride + 1.
    """
    B, L, D = x.shape

    # Non-overlapping windows (module default kernel_size == stride).
    # TODO(synk): kernel_size != stride needs an overlapping-window (halo)
    # path; not implemented here.
    assert kernel_size == stride, "tiled Pallas path assumes kernel_size == stride"

    L_out = (L - kernel_size) // stride + 1
    assert L_out >= 1, "input length shorter than the pooling window"
    L_trim = L_out * stride

    itemsize = jnp.dtype(x.dtype).itemsize

    # ---- lane-dense row grouping --------------------------------------------
    # Pack g consecutive output rows per physical row so the output's last dim
    # (g*D) is a multiple of 128 -> unmasked, dense vst + dense HBM writeback.
    # g == 1 when D is already a multiple of 128.  Fall back to g == 1 if the
    # grouping would not divide the row count or would need too many unrolled
    # lane slices (g capped at 16).
    if D % 128 == 0:
        g = 1
    else:
        g = 128 // math.gcd(D, 128)
        if g > 16 or (B * L_out) % g != 0:
            g = 1  # correctness first; output stores may be masked in this case

    R = (B * L_out) // g           # physical rows of the flattened problem
    W_in = g * kernel_size * D     # each physical row's pooling windows, contiguous
    W_out = g * D

    # Drop tail rows that do not form a complete window (no-op when L_trim == L),
    # then flatten.  For contiguous row-major data this reshape is metadata-only:
    # row r of x2 holds the g*kernel_size input rows feeding output rows
    # [r*g, (r+1)*g).
    x_trim = x if L_trim == L else x[:, :L_trim, :]
    x2 = x_trim.reshape(R, W_in)

    # ---- row-tile selection ---------------------------------------------------
    # ~2 MiB input blocks: many grid steps for the pipeline, and
    # 2 x (2 MiB in + 1 MiB out) double-buffered stays far under the scoped-VMEM
    # default on every generation (16 MiB v5e / 32 MiB v6e / 32 MiB v7x).
    # TODO(synk): for extremely large D (W_in row wider than ~1 MiB) a column
    # tiling pass would be needed; not required for this module's shapes.
    TARGET_IN_BLOCK_BYTES = 2 * 1024 * 1024
    bytes_per_row = max(W_in * itemsize, 1)
    tr = (TARGET_IN_BLOCK_BYTES // bytes_per_row) // 8 * 8
    tr = max(8, min(tr, 1024))
    if R <= tr:
        tr = R  # full row extent is always a legal block dim
    grid = (pl.cdiv(R, tr),)

    # ---- kernel body ----------------------------------------------------------
    # Partial last row block: Pallas pads OOB input rows and masks OOB output
    # writes.  Each output row depends only on its own input row, so padded
    # inputs only ever feed masked outputs -- correct for max.  (Do not break
    # this invariant when adding an overlapping-window path.)
    def kernel(x_ref, o_ref):
        xb = x_ref[...]  # (tr, g * kernel_size * D)
        pieces = []
        for p in range(g):
            base = p * kernel_size * D
            acc = xb[:, base:base + D]
            for k in range(1, kernel_size):
                acc = jnp.maximum(acc, xb[:, base + k * D:base + (k + 1) * D])
            pieces.append(acc)
        o_ref[...] = pieces[0] if g == 1 else jnp.concatenate(pieces, axis=-1)

    cost = pl.CostEstimate(
        flops=R * W_out * (kernel_size - 1),  # compare ops counted as flops (hint only)
        transcendentals=0,
        bytes_accessed=(R * W_in + R * W_out) * itemsize,
    )

    out2 = pl.pallas_call(
        kernel,
        out_shape=jax.ShapeDtypeStruct((R, W_out), x.dtype),
        grid=grid,
        in_specs=[pl.BlockSpec((tr, W_in), lambda r: (r, 0))],
        out_specs=pl.BlockSpec((tr, W_out), lambda r: (r, 0)),
        compiler_params=pltpu.CompilerParams(
            dimension_semantics=("parallel",),
        ),
        cost_estimate=cost,
    )(x2)

    return out2.reshape(B, L_out, D)


def max_pool1d_ref(x, kernel_size=2, stride=2):
    """Pure-JAX reference matching F.max_pool1d over the length axis."""
    B, L, D = x.shape
    L_out = (L - kernel_size) // stride + 1
    windows = jnp.stack(
        [x[:, k:k + stride * (L_out - 1) + 1:stride, :] for k in range(kernel_size)],
        axis=0,
    )
    return jnp.max(windows, axis=0)


if __name__ == "__main__":
    key = jax.random.PRNGKey(0)
    B, L, D = 2, 16, 32  # (batch, seq, hidden) — 'b l d' layout of the module
    x = jax.random.normal(key, (B, L, D), dtype=jnp.float32)

    out = max_pool1d_pallas(x, kernel_size=2, stride=2)
    out = jax.block_until_ready(out)

    ref = max_pool1d_ref(x, kernel_size=2, stride=2)
    assert out.shape == (B, L // 2, D), out.shape
    assert jnp.allclose(out, ref), "Pallas maxpool mismatch vs reference"

    print("KERNEL_OK")
</pallas_src>

<mosaic_0001>
module attributes {stable_mosaic.version = 11 : i64} {
  func.func @kernel(%arg0: i32, %arg1: memref<4x256xf32, #tpu.memory_space<vmem>>, %arg2: memref<4x128xf32, #tpu.memory_space<vmem>>) attributes {dimension_semantics = [#tpu.dimension_semantics<parallel>], iteration_bounds = array<i64: 1>, scalar_prefetch = 0 : i64, scratch_operands = 0 : i64, tpu.core_type = #tpu.core_type<tc>, window_params = [{transform_indices = @transform_0, window_bounds = array<i64: 4, 256>}, {transform_indices = @transform_1, window_bounds = array<i64: 4, 128>}]} {
    %c0 = arith.constant 0 : index
    %c0_0 = arith.constant 0 : index
    %0 = vector.load %arg1[%c0, %c0_0] : memref<4x256xf32, #tpu.memory_space<vmem>>, vector<4x256xf32>
    %1 = vector.extract_strided_slice %0 {offsets = [0, 0], sizes = [4, 32], strides = [1, 1]} : vector<4x256xf32> to vector<4x32xf32>
    %2 = vector.extract_strided_slice %0 {offsets = [0, 32], sizes = [4, 32], strides = [1, 1]} : vector<4x256xf32> to vector<4x32xf32>
    %3 = arith.maximumf %1, %2 : vector<4x32xf32>
    %4 = vector.extract_strided_slice %0 {offsets = [0, 64], sizes = [4, 32], strides = [1, 1]} : vector<4x256xf32> to vector<4x32xf32>
    %5 = vector.extract_strided_slice %0 {offsets = [0, 96], sizes = [4, 32], strides = [1, 1]} : vector<4x256xf32> to vector<4x32xf32>
    %6 = arith.maximumf %4, %5 : vector<4x32xf32>
    %7 = vector.extract_strided_slice %0 {offsets = [0, 128], sizes = [4, 32], strides = [1, 1]} : vector<4x256xf32> to vector<4x32xf32>
    %8 = vector.extract_strided_slice %0 {offsets = [0, 160], sizes = [4, 32], strides = [1, 1]} : vector<4x256xf32> to vector<4x32xf32>
    %9 = arith.maximumf %7, %8 : vector<4x32xf32>
    %10 = vector.extract_strided_slice %0 {offsets = [0, 192], sizes = [4, 32], strides = [1, 1]} : vector<4x256xf32> to vector<4x32xf32>
    %11 = vector.extract_strided_slice %0 {offsets = [0, 224], sizes = [4, 32], strides = [1, 1]} : vector<4x256xf32> to vector<4x32xf32>
    %12 = arith.maximumf %10, %11 : vector<4x32xf32>
    %13 = tpu.concatenate %3, %6, %9, %12 in 1 : vector<4x32xf32>, vector<4x32xf32>, vector<4x32xf32>, vector<4x32xf32> -> vector<4x128xf32>
    %c0_1 = arith.constant 0 : index
    %c0_2 = arith.constant 0 : index
    %14 = vector.load %arg2[%c0_1, %c0_2] : memref<4x128xf32, #tpu.memory_space<vmem>>, vector<4x128xf32>
    tpu.vector_store %arg2[%c0_1, %c0_2], %13 {strides = array<i32>} : memref<4x128xf32, #tpu.memory_space<vmem>>, vector<4x128xf32>,
    return
  }
  func.func @transform_0(%arg0: i32) -> (i32, i32) {
    %c0_i32 = arith.constant 0 : i32
    %c0_i32_0 = arith.constant 0 : i32
    return %arg0, %c0_i32 : i32, i32
  }
  func.func @transform_1(%arg0: i32) -> (i32, i32) {
    %c0_i32 = arith.constant 0 : i32
    %c0_i32_0 = arith.constant 0 : i32
    return %arg0, %c0_i32 : i32, i32
  }
}

</mosaic_0001>

<bundles_post_ra>
// kernel: tpu_custom_call.1
= control target key start
LH: loop header
LB: loop body
LE: loop exit
PB: predicated region body
PF: predicated region fallthrough
CT: control target
= control target key end

     0   :  { %6 = vsyncpa [#allocation3], 0  ;;  %s145_s0 = inlined_call_operand.hbm [shape: f32[4,256], index: 0, kind: input, shape index: {}]   ;;  %s146_s1 = inlined_call_operand.hbm [shape: f32[4,128], index: 1, kind: output, shape index: {}]  }
   0x1   :  { %7 = vsyncpa [#allocation4], 0  ;;  %s124_s6 = smov [#allocation2]  }
   0x2   :  { %s14_s7 = sshll.u32 %s124_s6, 4  ;;  %s15_s7 = int_to_ptr.vmem [resolvable:$true] %s14_s7 }
   0x3   :  { %s88_s8 = scalar_lea.vmem %s15_s7, 128  ;;  %p93_p1 = scmp.lt.s32.totalorder %s15_s7, %s15_s7 }
   0x4   :  { %p89_p0 = scmp.ne.s32.totalorder %s15_s7, %s88_s8  ;;  %p94_p2 = scmp.lt.s32.totalorder %s88_s8, %s88_s8 }
   0x6   :  { %p95_p3 = por %p94_p2, %p93_p1 }
   0x8   :  { %p96_p4 = pnand %p95_p3, %p89_p0 }
   0xa   :  { %99 = shalt.err (!%p96_p4)
}
   0xb   :  { %17 = dma.hbm_to_vmem [thread:$0]  %s145_s0, 128, %s15_s7, [#allocation3]  }
   0xc   :  { %120 = dma.done.wait [#allocation3], 128  }
   0xd   :  { %121 = vsyncadd [#allocation3], 4294967168  ;;  %v21_v0 = vld [vmem:[#allocation2] sm:$0xff]  ;;  %s125_s11 = smov 96   ;;  %s126_s12 = smov 32   ;;  %vm53_vm0 = vcmask 261120  }
   0xe   :  { %23 = vrot.lane.b32.xlu0 %v21_v0, %s125_s11  ;;  %36 = vrot.lane.b32.xlu1 %v21_v0, %s126_s12  ;;  %s127_s13 = smov 64   ;;  %v27_v1 = vrot.slane %v21_v0, 4  ;;  %vm55_vm1 = vcmask 523264   ;;  %s128_s0 = smov [#allocation5]   ;;  %vm57_vm2 = vcmask 785408  }
   0xf   :  { %s66_s14 = sshll.u32 %s128_s0, 4  ;;  %s67_s14 = int_to_ptr.vmem [resolvable:$true] %s66_s14 }
  0x10   :  { %s100_s15 = scalar_lea.vmem %s67_s14, 64  ;;  %p105_p6 = scmp.lt.s32.totalorder %s67_s14, %s67_s14 }
  0x11   :  { %p101_p5 = scmp.ne.s32.totalorder %s67_s14, %s100_s15  ;;  %p106_p7 = scmp.lt.s32.totalorder %s100_s15, %s100_s15 }
  0x12   :  { %32 = vrot.lane.b32.xlu0 %v21_v0, %s127_s13 }
  0x13   :  { %p107_p8 = por %p106_p7, %p105_p6 }
  0x15   :  { %p108_p9 = pnand %p107_p8, %p101_p5 }
  0x80   :  { %v24_v2 = vpop.permute.xlu0 %23  ;;  %v37_v3 = vpop.permute.xlu1 %36 }
  0x81   :  { %v26_v4 = vmax.f32 %v21_v0, %v24_v2  ;;  %v29_v5 = vrot.slane %v24_v2, 4  ;;  %v38_v7 = vrot.slane %v37_v3, 4 }
  0x83   :  { %v31_v6 = vmax.f32 %v27_v1, %v29_v5  ;;  %42 = vrot.lane.b32.xlu1 %v26_v4, %s125_s11 }
  0x84   :  { %v33_v8 = vpop.permute.xlu0 %32 }
  0x85   :  { %v34_v9 = vrot.slane %v33_v8, 4  ;;  %46 = vrot.lane.b32.xlu0 %v31_v6, %s127_s13 }
  0x87   :  { %v40_v10 = vmax.f32 %v34_v9, %v38_v7 }
  0x89   :  { %50 = vrot.lane.b32.xlu1 %v40_v10, %s125_s11 }
  0xf5   :  { %v43_v11 = vpop.permute.xlu1 %42 }
  0xf6   :  { %v54_v12 = vsel %vm53_vm0, %v26_v4, %v43_v11 }
  0xf7   :  { %v47_v13 = vpop.permute.xlu0 %46 }
  0xf8   :  { %v56_v14 = vsel %vm55_vm1, %v54_v12, %v47_v13 }
  0xfb   :  { %v51_v15 = vpop.permute.xlu1 %50 }
  0xfc   :  { %v58_v16 = vsel %vm57_vm2, %v56_v14, %v51_v15 }
  0xfd   :  { %59 = vst [vmem:[#allocation5] sm:$0xf] %v58_v16 }
  0xfe   :  { %111 = shalt.err (!%p108_p9)
}
  0xff   :  { %69 = dma.vmem_to_hbm [thread:$0]  %s67_s14, 64, %s146_s1, [#allocation4]  }
 0x100   :  { %122 = dma.done.wait [#allocation4], 64  }
 0x101   :  { %123 = vsyncadd [#allocation4], 4294967232 }
 0x102   :  { %73 = vsyncpa [#allocation3], 1 }
 0x103   :  { %74 = vsyncpa [#allocation4], 1 }

</bundles_post_ra>
